<compile_context>
chip_gen: v6e
topology: v6e:2x2x1
jax: 0.10.0
libtpu: 0.0.40
codegen_flags: <defaults>
</compile_context>

<pallas_src>
import jax
import jax.numpy as jnp
from jax.experimental import pallas as pl
from jax.experimental.pallas import tpu as pltpu


def _copy_kernel(x_ref, o_ref):
    # Straight VMEM copy; the chomp lives entirely in the BlockSpecs.
    o_ref[...] = x_ref[...]


def _slice_kernel(x_ref, o_ref):
    # Fallback for tiny L_out: full-extent blocks, slice inside the kernel.
    o_ref[...] = x_ref[:, :, : o_ref.shape[-1]]


def chomp1d(x: jax.Array, chomp_size: int) -> jax.Array:
    """Pallas equivalent of Chomp1d(chomp_size)(x) for x of shape (N, C, L)."""
    assert x.ndim == 3, "expected (N, C, L) input"
    n, c, l = x.shape
    assert 0 < chomp_size < l, "chomp_size must be in (0, L)"
    l_out = l - chomp_size

    itemsize = jnp.dtype(x.dtype).itemsize
    # Sublane packing granularity: 8 for f32, 16 for bf16/f16, 32 for int8/fp8.
    sub = max(8, 32 // itemsize)

    if l_out >= 128:
        # --- Lane-aligned, BlockSpec-chomp path -----------------------------
        # Lane tile: large multiple of 128, capped at 1024 lanes.
        lt = min(1024, (l_out // 128) * 128)
        # Channel tile: multiple of `sub`, sized so one block is ~2 MiB
        # => double-buffered in+out footprint <= ~8 MiB (fits every generation,
        #    including v7x's smaller scoped-VMEM default).
        ct_cap = max(sub, ((2 * 1024 * 1024) // (lt * itemsize)) // sub * sub)
        ct = c if c <= ct_cap else ct_cap

        grid = (n, pl.cdiv(c, ct), pl.cdiv(l_out, lt))
        kernel = _copy_kernel
        in_spec = pl.BlockSpec((1, ct, lt), lambda i, ci, li: (i, ci, li))
        out_spec = pl.BlockSpec((1, ct, lt), lambda i, ci, li: (i, ci, li))
        dims = ("parallel", "parallel", "parallel")
    else:
        # --- Tiny-L_out fallback (e.g. the demo's L_out = 13) ---------------
        # Block shapes equal the full array dims on the last two axes, which is
        # always legal; the in-kernel slice drops the chomped tail.
        grid = (n,)
        kernel = _slice_kernel
        in_spec = pl.BlockSpec((1, c, l), lambda i: (i, 0, 0))
        out_spec = pl.BlockSpec((1, c, l_out), lambda i: (i, 0, 0))
        dims = ("parallel",)

    return pl.pallas_call(
        kernel,
        out_shape=jax.ShapeDtypeStruct((n, c, l_out), x.dtype),
        grid=grid,
        in_specs=[in_spec],
        out_specs=out_spec,
        compiler_params=pltpu.CompilerParams(
            dimension_semantics=dims,
            vmem_limit_bytes=32 * 1024 * 1024,
        ),
    )(x)


if __name__ == "__main__":
    key = jax.random.PRNGKey(0)

    # Small demo shape consistent with a temporal-conv input: (batch, channels, seq).
    N, C, L = 2, 4, 16
    chomp_size = 3
    x = jax.random.normal(key, (N, C, L), dtype=jnp.float32)

    out = jax.block_until_ready(chomp1d(x, chomp_size))
    ref = x[:, :, :-chomp_size]
    assert out.shape == (N, C, L - chomp_size), out.shape
    assert out.dtype == x.dtype
    assert jnp.array_equal(out, ref), "mismatch vs reference slice (small path)"

    # Second check exercising the lane-aligned BlockSpec-chomp path.
    x2 = jax.random.normal(jax.random.PRNGKey(0), (2, 8, 259), dtype=jnp.float32)
    out2 = jax.block_until_ready(chomp1d(x2, 3))
    ref2 = x2[:, :, :-3]
    assert out2.shape == ref2.shape
    assert jnp.array_equal(out2, ref2), "mismatch vs reference slice (tiled path)"

    print("KERNEL_OK")
</pallas_src>

<mosaic_0001>
module attributes {stable_mosaic.version = 11 : i64} {
  func.func @_slice_kernel(%arg0: i32, %arg1: memref<1x4x16xf32, #tpu.memory_space<vmem>>, %arg2: memref<1x4x13xf32, #tpu.memory_space<vmem>>) attributes {dimension_semantics = [#tpu.dimension_semantics<parallel>], iteration_bounds = array<i64: 2>, scalar_prefetch = 0 : i64, scratch_operands = 0 : i64, tpu.core_type = #tpu.core_type<tc>, window_params = [{transform_indices = @transform_0, window_bounds = array<i64: 1, 4, 16>}, {transform_indices = @transform_1, window_bounds = array<i64: 1, 4, 13>}]} {
    %c0 = arith.constant 0 : index
    %c0_0 = arith.constant 0 : index
    %c0_1 = arith.constant 0 : index
    %0 = vector.load %arg1[%c0, %c0_0, %c0_1] : memref<1x4x16xf32, #tpu.memory_space<vmem>>, vector<1x4x13xf32>
    %c0_2 = arith.constant 0 : index
    %c0_3 = arith.constant 0 : index
    %c0_4 = arith.constant 0 : index
    %1 = vector.load %arg2[%c0_2, %c0_3, %c0_4] : memref<1x4x13xf32, #tpu.memory_space<vmem>>, vector<1x4x13xf32>
    tpu.vector_store %arg2[%c0_2, %c0_3, %c0_4], %0 {strides = array<i32>} : memref<1x4x13xf32, #tpu.memory_space<vmem>>, vector<1x4x13xf32>,
    return
  }
  func.func @transform_0(%arg0: i32) -> (i32, i32, i32) {
    %c0_i32 = arith.constant 0 : i32
    %c0_i32_0 = arith.constant 0 : i32
    %c0_i32_1 = arith.constant 0 : i32
    return %arg0, %c0_i32, %c0_i32_0 : i32, i32, i32
  }
  func.func @transform_1(%arg0: i32) -> (i32, i32, i32) {
    %c0_i32 = arith.constant 0 : i32
    %c0_i32_0 = arith.constant 0 : i32
    %c0_i32_1 = arith.constant 0 : i32
    return %arg0, %c0_i32, %c0_i32_0 : i32, i32, i32
  }
}

</mosaic_0001>

<bundles_post_ra>
// kernel: tpu_custom_call.1
= control target key start
LH: loop header
LB: loop body
LE: loop exit
PB: predicated region body
PF: predicated region fallthrough
CT: control target
= control target key end

     0   :  { %6 = vsyncpa [#allocation3], 0  ;;  %s530_s0 = inlined_call_operand.hbm [shape: f32[2,4,16], index: 0, kind: input, shape index: {}]   ;;  %s531_s1 = inlined_call_operand.hbm [shape: f32[2,4,13], index: 1, kind: output, shape index: {}]  }
   0x1   :  { %8 = vsyncpa [#allocation3 + $0x1], 0 }
   0x2   :  { %9 = vsyncpa [#allocation4], 0 }
   0x3   :  { %11 = vsyncpa [#allocation4 + $0x1], 0  ;;  %s383_s6 = smov 0   ;;  %s385_s7 = smov 0  }
   0x4   :  { %s387_s8 = smov 0   ;;  %s389_s9 = smov 0  }
   0x5 LB: > { %s404_s10 = sadd.s32 4294967295, %s369_s9   ;;  %s219_s11 = sadd.s32 4294967294, %s369_s9   ;;  %s369_s9 = sphi %s389_s9, %s548_s9   ;;  %s365_s8 = sphi %s387_s8, %s547_s8   ;;  %s361_s7 = sphi %s385_s7, %s546_s7   ;;  %s357_s6 = sphi %s383_s6, %s545_s6  }
   0x6   : > { %s408_s12 = sadd.s32 1, %s369_s9   ;;  %s24_s13 = sadd.s32 1, %s365_s8 }
   0x7   : > { %s21_s14 = ssub.s32 %s369_s9, %s408_s12  ;;  %p31_p0 = scmp.ne.s32.totalorder %s365_s8, %s361_s7 }
   0x8   : > { %p22_p1 = scmp.eq.s32.totalorder %s21_s14, 0  ;;  %p32_p2 = scmp.eq.s32.totalorder %s369_s9, 0 }
   0x9   : > { %p37_p3 = scmp.ne.s32.totalorder %s361_s7, %s357_s6  ;;  %p38_p4 = scmp.eq.s32.totalorder %s404_s10, 0 }
   0xa   : > { %s420_s15 = scalar_select %p22_p1, %s365_s8, %s24_s13  }
   0xb   : > { %p422_p5 = por %p32_p2, %p31_p0  ;;  %p426_p6 = por %p38_p4, %p37_p3 }
   0xc   : > { %p61_p7 = scmp.eq.s32.totalorder %s404_s10, 1  ;;  %p67_p8 = scmp.eq.s32.totalorder %s219_s11, 1 }
   0xd   : > { %s535_s17 = scalar_select %p426_p6, 1, 0 }
   0xe   : > { %p243_p10 = scmp.lt.s32.totalorder %s369_s9, 2  ;;  %p433_p11 = por %p61_p7, %p31_p0 }
   0xf   : > { %p437_p12 = por %p67_p8, %p37_p3  ;;  %s87_s20 = sand.u32 1, %s365_s8  }
  0x10   : > { %s536_s18 = scalar_select %p433_p11, 1, 0 }
  0x11   : > { %s537_s19 = scalar_select %p437_p12, 1, 0 }
  0x12   : > { %s223_s21 = sshll.u32 %s369_s9, 6  ;;  %s222_s22 = sshll.u32 %s87_s20, 2 }
  0x13   : > { %s446_s25 = scalar_lea.hbm %s530_s0, %s223_s21  ;;  %s91_s26 = scalar_lea.vmem [#allocation2], %s222_s22 }
  0x14   : > { %s98_s27 = sshll.u32 %s91_s26, 4  ;;  %p450_p13 = pnand %p243_p10, %p422_p5  ;;  %s454_s27 = int_to_ptr.vmem [resolvable:$true] %s98_s27 }
  0x15   : > { %s88_s29 = scalar_lea.sflag [#allocation3], %s87_s20  ;;  %s277_s30 = scalar_lea.hbm %s446_s25, 64 }
  0x16   : > { %p278_p2 = scmp.ne.s32.totalorder %s446_s25, %s277_s30  ;;  %p279_p3 = pneg %p450_p13 }
  0x17   : > { %s282_s4 = scalar_lea.hbm %s530_s0, 128  ;;  %p283_p5 = scmp.lt.s32.totalorder %s446_s25, %s530_s0 }
  0x18   : > { %p280_p4 = pnand %p279_p3, %p278_p2  ;;  %p284_p8 = scmp.lt.s32.totalorder %s282_s4, %s277_s30 }
  0x1a   : > { %p281_p7 = pneg %p280_p4  ;;  %p285_p10 = por %p284_p8, %p283_p5 }
  0x1c   : > { %p286_p9 = pnand %p285_p10, %p281_p7 }
  0x1e   : > { %289 = shalt.err (!%p286_p9)
}
  0x1f   : > { %s290_s13 = scalar_lea.vmem %s454_s27, 64  ;;  %s371_s14 = smov [#allocation2]  }
  0x20   : > { %p291_p0 = scmp.ne.s32.totalorder %s454_s27, %s290_s13  ;;  %s295_s16 = sshll.u32 %s371_s14, 4  ;;  %s296_s16 = int_to_ptr.vmem [resolvable:$false] %s295_s16 }
  0x21   : > { %s297_s20 = scalar_lea.vmem %s296_s16, 128  ;;  %p298_p4 = scmp.lt.s32.totalorder %s454_s27, %s296_s16 }
  0x22   : > { %p293_p1 = pnand %p291_p0, %p279_p3  ;;  %p299_p12 = scmp.lt.s32.totalorder %s297_s20, %s290_s13 }
  0x24   : > { %p294_p2 = pneg %p293_p1  ;;  %p300_p11 = por %p299_p12, %p298_p4 }
  0x26   : > { %p301_p6 = pnand %p300_p11, %p294_p2 }
  0x28   : > { %304 = shalt.err (!%p301_p6)
}
  0x29   : > { %238 = dma.hbm_to_vmem [thread:$0]  (!%p450_p13), %s446_s25, 64, %s454_s27, %s88_s29  }
  0x2a   : > { %p539_p9 = scmp.lt.s32.totalorder %s369_s9, 3  ;;  %p540_p7 = scmp.ge.s32.totalorder %s369_s9, 1 }
  0x2c   : > { %p104_p0 = pnand %p540_p7, %p539_p9 }
  0x2d   : > { %s481_s21 = sand.u32 (!%p104_p0), 1, %s361_s7   ;;  %p541_p6 = scmp.ne.s32.totalorder (!%p104_p0), %s535_s17, 0 }
  0x2e   : > { %107 = sbr.rel (%p104_p0) target bundleno = 77 (0x4d), region = 24  ;;  %s225_s22 = sshll.u32 (!%p104_p0), %s481_s21, 2 }
  0x2f   : > { %s110_s23 = scalar_lea.sflag (!%p104_p0), [#allocation3], %s481_s21  ;;  %s113_s24 = scalar_lea.vmem (!%p104_p0), [#allocation2], %s225_s22 }
  0x33   : > { %348 = dma.done.wait (%p541_p6), %s110_s23, 64  }
  0x34   : > { %350 = vsyncadd (%p541_p6), %s110_s23, 4294967232  ;;  %s131_s25 = scalar_lea.vmem [#allocation5], %s225_s22  ;;  %s228_s27 = sshll.u32 %s404_s10, 6  ;;  %vm133_vm0 = vcmask 101376   ;;  %v132_v0 = vld [vmem:[%s113_s24] sm:$0xf] }
  0x35   : > { %s149_s26 = sshll.u32 %s131_s25, 4  ;;  %s147_s30 = scalar_lea.hbm %s531_s1, %s228_s27  ;;  %134 = vst.msk [vmem:[%s131_s25] sm:$0xf] %vm133_vm0, %v132_v0  ;;  %s490_s26 = int_to_ptr.vmem [resolvable:$true] %s149_s26 }
  0x36   : > { %s136_s17 = scalar_lea.sflag [#allocation4], %s481_s21  ;;  %s305_s2 = scalar_lea.vmem %s490_s26, 64 }
  0x37   : > { %p306_p11 = scmp.ne.s32.totalorder %s490_s26, %s305_s2  ;;  %p542_p12 = scmp.ne.s32.totalorder %s536_s18, 0 }
  0x38   : > { %s372_s3 = smov [#allocation5]  }
  0x39   : > { %p307_p13 = pnand %p306_p11, %p542_p12  ;;  %s309_s10 = sshll.u32 %s372_s3, 4  ;;  %s310_s10 = int_to_ptr.vmem [resolvable:$false] %s309_s10 }
  0x3a   : > { %s311_s4 = scalar_lea.vmem %s310_s10, 128  ;;  %p312_p3 = scmp.lt.s32.totalorder %s490_s26, %s310_s10 }
  0x3b   : > { %p308_p1 = pneg %p307_p13  ;;  %p313_p5 = scmp.lt.s32.totalorder %s311_s4, %s305_s2 }
  0x3d   : > { %p314_p8 = por %p313_p5, %p312_p3 }
  0x3f   : > { %p315_p10 = pnand %p314_p8, %p308_p1 }
  0x41   : > { %318 = shalt.err (!%p315_p10)
}
  0x42   : > { %s319_s5 = scalar_lea.hbm %s147_s30, 64  ;;  %s323_s14 = scalar_lea.hbm %s531_s1, 128 }
  0x43   : > { %p320_p2 = scmp.ne.s32.totalorder %s147_s30, %s319_s5  ;;  %p324_p7 = scmp.lt.s32.totalorder %s147_s30, %s531_s1 }
  0x44   : > { %p325_p0 = scmp.lt.s32.totalorder %s323_s14, %s319_s5 }
  0x45   : > { %p321_p4 = pnand %p320_p2, %p542_p12 }
  0x46   : > { %p326_p6 = por %p325_p0, %p324_p7 }
  0x47   : > { %p322_p9 = pneg %p321_p4 }
  0x49   : > { %p327_p11 = pnand %p326_p6, %p322_p9 }
  0x4b   : > { %330 = shalt.err (!%p327_p11)
}
  0x4c   : > { %233 = dma.vmem_to_hbm [thread:$0]  (%p542_p12), %s490_s26, 64, %s147_s30, %s136_s17  }
  0x4d PF: > { %s161_s21 = sand.u32 1, %s357_s6   ;;  %p543_p13 = scmp.ne.s32.totalorder %s537_s19, 0 }
  0x4e   : > { %p544_p1 = scmp.ge.s32.totalorder %s369_s9, 2  ;;  %s162_s22 = scalar_lea.sflag [#allocation4], %s161_s21 }
  0x50   : > { %p240_p3 = pnand %p544_p1, %p543_p13 }
  0x52   : > { %p241_p5 = pneg %p240_p3 }
  0x54   : > { %352 = dma.done.wait (%p241_p5), %s162_s22, 64  }
  0x55   : > { %354 = vsyncadd (%p241_p5), %s162_s22, 4294967232  ;;  %p14_p8 = scmp.ge.s32.totalorder %s408_s12, 4   ;;  %s545_s6 = smov %s361_s7 }
  0x56   : > { %s546_s7 = smov %s365_s8  ;;  %s547_s8 = smov %s420_s15 }
  0x57   : > { %s548_s9 = smov %s408_s12  ;;  %16 = sbr.rel (!%p14_p8) target bundleno = 5 (0x5), region = 69 }
  0x5c   :  { %167 = vsyncpa [#allocation3], 1 }
  0x5d   :  { %169 = vsyncpa [#allocation3 + $0x1], 1 }
  0x5e   :  { %170 = vsyncpa [#allocation4], 1 }
  0x5f   :  { %172 = vsyncpa [#allocation4 + $0x1], 1 }

</bundles_post_ra>
